<compile_context>
chip_gen: v6e
topology: v6e:2x2x1
jax: 0.10.0
libtpu: 0.0.40
codegen_flags: <defaults>
</compile_context>

<pallas_src>
import jax
import jax.numpy as jnp
from jax.experimental import pallas as pl
from jax.experimental.pallas import tpu as pltpu

ALPHA = 2
BETA = 4
LANE = 128
SUBLANE = 8
MAX_BLOCK_ROWS = 1024  # (1024, 128) f32 block = 512 KiB


def _round_up(x, m):
    return ((x + m - 1) // m) * m


def _make_kernel(has_mask, n_valid, block_rows, steps_per_core, needs_tail_mask):
    """Builds the focal-loss partial-sum kernel (closed over static config)."""
    block_elems = block_rows * LANE

    def kernel(*refs):
        if has_mask:
            pred_ref, gt_ref, mask_ref, npos_ref, loss_ref, acc_npos, acc_loss = refs
        else:
            pred_ref, gt_ref, npos_ref, loss_ref, acc_npos, acc_loss = refs
            mask_ref = None

        c = pl.program_id(0)   # core / outer split
        i = pl.program_id(1)   # streaming step within this core's range

        # Zero the block-shaped accumulators at the start of each core's range.
        @pl.when(i == 0)
        def _():
            acc_npos[...] = jnp.zeros_like(acc_npos)
            acc_loss[...] = jnp.zeros_like(acc_loss)

        pred = pred_ref[...].astype(jnp.float32)
        gt = gt_ref[...].astype(jnp.float32)

        if needs_tail_mask:
            # Global element index of each lane in this block; anything >= n
            # (lane-pad or out-of-bounds garbage rows of the partial last
            # block) is replaced by safe values and zeroed out of both
            # indicator masks, so it contributes exactly 0.
            base = (c * steps_per_core + i) * block_elems
            row = jax.lax.broadcasted_iota(jnp.int32, (block_rows, LANE), 0)
            lane = jax.lax.broadcasted_iota(jnp.int32, (block_rows, LANE), 1)
            valid = (base + row * LANE + lane) < n_valid
            valid_f = valid.astype(jnp.float32)
            pred = jnp.where(valid, pred, 0.5)   # keeps both logs finite
            gt = jnp.where(valid, gt, 0.0)
        else:
            valid_f = None

        pos_inds = (gt == 1.0).astype(jnp.float32)
        neg_inds = (gt < 1.0).astype(jnp.float32)
        if valid_f is not None:
            pos_inds = pos_inds * valid_f
            neg_inds = neg_inds * valid_f
        if has_mask:
            m = mask_ref[...].astype(jnp.float32)
            pos_inds = pos_inds * m
            neg_inds = neg_inds * m

        # Explicit squarings (pure VPU) instead of ** lowering.
        one_m_pred = 1.0 - pred
        one_m_gt = 1.0 - gt
        t2 = one_m_gt * one_m_gt
        neg_weights = t2 * t2              # (1 - gt) ** 4
        q2 = one_m_pred * one_m_pred       # (1 - pred) ** 2
        p2 = pred * pred                   # pred ** 2

        pos_loss = jnp.log(pred) * q2 * pos_inds
        neg_loss = jnp.log(one_m_pred) * p2 * neg_weights * neg_inds

        # Block-shaped accumulation: no XLU / scalar stores on the per-step
        # critical path. (pos_loss + neg_loss) is enough because pos_loss is
        # identically 0 whenever num_pos == 0, so the final branch only needs
        # num_pos and the combined sum.
        acc_npos[...] = acc_npos[...] + pos_inds
        acc_loss[...] = acc_loss[...] + (pos_loss + neg_loss)

        # Single cross-lane reduce + tiny store per core, at the last step.
        @pl.when(i == pl.num_programs(1) - 1)
        def _():
            npos_ref[...] = jnp.sum(
                acc_npos[...], axis=(0, 1), keepdims=True).reshape(1, 1, 1)
            loss_ref[...] = jnp.sum(
                acc_loss[...], axis=(0, 1), keepdims=True).reshape(1, 1, 1)

    return kernel


def _focal_partial_sums(pred2d, gt2d, mask2d, n_valid):
    """Returns per-core partial (num_pos, pos_loss + neg_loss) sums."""
    R = pred2d.shape[0]
    block_rows = min(MAX_BLOCK_ROWS, _round_up(R, SUBLANE))
    total_blocks = (R + block_rows - 1) // block_rows

    # Split blocks across 2 cores only when they divide evenly; on v7x this
    # gives both TensorCores their own stream, on v5e/v6e it is a no-op loop
    # split. (Odd block counts just run on a single "core" index.)
    num_cores = 2 if (total_blocks >= 2 and total_blocks % 2 == 0) else 1
    steps_per_core = total_blocks // num_cores

    covered = total_blocks * block_rows * LANE
    needs_tail_mask = (n_valid != covered)

    has_mask = mask2d is not None

    def in_map(c, i):
        return (c * steps_per_core + i, 0)

    in_spec = pl.BlockSpec((block_rows, LANE), in_map)
    in_specs = [in_spec, in_spec] + ([in_spec] if has_mask else [])
    out_spec = pl.BlockSpec((1, 1, 1), lambda c, i: (c, 0, 0))
    out_shape = jax.ShapeDtypeStruct((num_cores, 1, 1), jnp.float32)

    kernel = _make_kernel(has_mask, n_valid, block_rows, steps_per_core,
                          needs_tail_mask)
    inputs = (pred2d, gt2d) + ((mask2d,) if has_mask else ())

    npos, loss = pl.pallas_call(
        kernel,
        out_shape=(out_shape, out_shape),
        grid_spec=pltpu.PrefetchScalarGridSpec(
            num_scalar_prefetch=0,
            grid=(num_cores, steps_per_core),
            in_specs=in_specs,
            out_specs=[out_spec, out_spec],
            scratch_shapes=[pltpu.VMEM((block_rows, LANE), jnp.float32)] * 2,
        ),
        compiler_params=pltpu.CompilerParams(
            dimension_semantics=("parallel", "arbitrary")),
    )(*inputs)
    return npos, loss


def focal_loss(pred, gt, mask=None):
    """Matches FocalLoss.forward(pred, gt, mask) from SAR/model.py."""
    n = pred.size
    pred_f = pred.reshape(-1)                       # native dtype, no upcast
    gt_f = gt.reshape(-1)
    mask_f = None if mask is None else mask.reshape(-1)

    # Only pad (a copy) in the rare case the element count is not a multiple
    # of 128; padded values are ignored via the in-kernel tail mask.
    if n % LANE != 0:
        pad = LANE - n % LANE
        pred_f = jnp.pad(pred_f, (0, pad))
        gt_f = jnp.pad(gt_f, (0, pad))
        if mask_f is not None:
            mask_f = jnp.pad(mask_f, (0, pad))

    R = pred_f.size // LANE
    pred2d = pred_f.reshape(R, LANE)                # free reshape (row-major)
    gt2d = gt_f.reshape(R, LANE)
    mask2d = None if mask_f is None else mask_f.reshape(R, LANE)

    npos, losssum = _focal_partial_sums(pred2d, gt2d, mask2d, n)
    num_pos = jnp.sum(npos)
    total = jnp.sum(losssum)    # == pos_loss + neg_loss

    # When num_pos == 0, pos_loss is identically 0, so -total == -neg_loss,
    # matching the PyTorch branch exactly.
    safe_denom = jnp.where(num_pos == 0.0, 1.0, num_pos)
    return jnp.where(num_pos == 0.0, -total, -total / safe_denom)


def _focal_loss_ref(pred, gt, mask=None):
    pred = pred.astype(jnp.float32)
    gt = gt.astype(jnp.float32)
    pos_inds = (gt == 1.0).astype(jnp.float32)
    neg_inds = (gt < 1.0).astype(jnp.float32)
    if mask is not None:
        mask = mask.astype(jnp.float32)
        pos_inds = pos_inds * mask
        neg_inds = neg_inds * mask
    neg_weights = (1.0 - gt) ** BETA
    pos_loss = (jnp.log(pred) * (1.0 - pred) ** ALPHA * pos_inds).sum()
    neg_loss = (jnp.log(1.0 - pred) * pred ** ALPHA * neg_weights * neg_inds).sum()
    num_pos = pos_inds.sum()
    return jnp.where(num_pos == 0.0, -neg_loss,
                     -(pos_loss + neg_loss) / jnp.where(num_pos == 0.0, 1.0, num_pos))


if __name__ == "__main__":
    key = jax.random.PRNGKey(0)
    k1, k2, k3, k4 = jax.random.split(key, 4)

    B, C, H, W = 2, 4, 16, 16
    # pred: sigmoid-like probabilities in (0, 1)
    pred = jax.nn.sigmoid(jax.random.normal(k1, (B, C, H, W), jnp.float32))
    pred = jnp.clip(pred, 1e-4, 1.0 - 1e-4)
    # gt: Gaussian-splat-style heatmap in [0, 1), with a few exact 1.0 peaks
    gt_soft = jax.random.uniform(k2, (B, C, H, W), jnp.float32) * 0.98
    peaks = jax.random.uniform(k3, (B, C, H, W), jnp.float32) < 0.03
    gt = jnp.where(peaks, 1.0, gt_soft)

    # 1) no-mask path (2-stream kernel variant)
    out = focal_loss(pred, gt)
    jax.block_until_ready(out)
    ref = _focal_loss_ref(pred, gt)
    assert jnp.allclose(out, ref, rtol=1e-4, atol=1e-4), (out, ref)

    # 2) masked path (3-stream kernel variant)
    msk = (jax.random.uniform(k4, (B, C, H, W), jnp.float32) < 0.7).astype(jnp.float32)
    out_m = focal_loss(pred, gt, msk)
    jax.block_until_ready(out_m)
    ref_m = _focal_loss_ref(pred, gt, msk)
    assert jnp.allclose(out_m, ref_m, rtol=1e-4, atol=1e-4), (out_m, ref_m)

    # 3) non-lane-aligned element count (exercises lane pad + in-kernel tail mask)
    shp = (1, 3, 15, 17)
    p2 = jnp.clip(jax.nn.sigmoid(jax.random.normal(k1, shp, jnp.float32)),
                  1e-4, 1.0 - 1e-4)
    g2 = jnp.where(jax.random.uniform(k3, shp, jnp.float32) < 0.05, 1.0,
                   jax.random.uniform(k2, shp, jnp.float32) * 0.98)
    out2 = focal_loss(p2, g2)
    jax.block_until_ready(out2)
    ref2 = _focal_loss_ref(p2, g2)
    assert jnp.allclose(out2, ref2, rtol=1e-4, atol=1e-4), (out2, ref2)

    print("KERNEL_OK")
</pallas_src>

<mosaic_0001>
module attributes {stable_mosaic.version = 11 : i64} {
  func.func @kernel(%arg0: i32, %arg1: i32, %arg2: memref<16x128xf32, #tpu.memory_space<vmem>>, %arg3: memref<16x128xf32, #tpu.memory_space<vmem>>, %arg4: memref<1x1x1xf32, #tpu.memory_space<vmem>>, %arg5: memref<1x1x1xf32, #tpu.memory_space<vmem>>, %arg6: memref<16x128xf32, #tpu.memory_space<vmem>>, %arg7: memref<16x128xf32, #tpu.memory_space<vmem>>) attributes {dimension_semantics = [#tpu.dimension_semantics<parallel>, #tpu.dimension_semantics<arbitrary>], iteration_bounds = array<i64: 1, 1>, scalar_prefetch = 0 : i64, scratch_operands = 2 : i64, tpu.core_type = #tpu.core_type<tc>, window_params = [{transform_indices = @transform_0, window_bounds = array<i64: 16, 128>}, {transform_indices = @transform_1, window_bounds = array<i64: 16, 128>}, {transform_indices = @transform_2, window_bounds = array<i64: 1, 1, 1>}, {transform_indices = @transform_3, window_bounds = array<i64: 1, 1, 1>}]} {
    %c0_i32 = arith.constant 0 : i32
    %0 = arith.cmpi eq, %arg1, %c0_i32 : i32
    %1 = arith.extui %0 : i1 to i32
    %c0_i32_0 = arith.constant 0 : i32
    %2 = arith.cmpi ne, %1, %c0_i32_0 : i32
    scf.if %2 {
      %cst_17 = arith.constant 0.000000e+00 : f32
      %38 = vector.broadcast %cst_17 : f32 to vector<16x128xf32>
      %c0_18 = arith.constant 0 : index
      %c0_19 = arith.constant 0 : index
      %39 = vector.load %arg6[%c0_18, %c0_19] : memref<16x128xf32, #tpu.memory_space<vmem>>, vector<16x128xf32>
      tpu.vector_store %arg6[%c0_18, %c0_19], %38 {strides = array<i32>} : memref<16x128xf32, #tpu.memory_space<vmem>>, vector<16x128xf32>,
      %cst_20 = arith.constant 0.000000e+00 : f32
      %40 = vector.broadcast %cst_20 : f32 to vector<16x128xf32>
      %c0_21 = arith.constant 0 : index
      %c0_22 = arith.constant 0 : index
      %41 = vector.load %arg7[%c0_21, %c0_22] : memref<16x128xf32, #tpu.memory_space<vmem>>, vector<16x128xf32>
      tpu.vector_store %arg7[%c0_21, %c0_22], %40 {strides = array<i32>} : memref<16x128xf32, #tpu.memory_space<vmem>>, vector<16x128xf32>,
    } else {
    }
    %c0 = arith.constant 0 : index
    %c0_1 = arith.constant 0 : index
    %3 = vector.load %arg2[%c0, %c0_1] : memref<16x128xf32, #tpu.memory_space<vmem>>, vector<16x128xf32>
    %c0_2 = arith.constant 0 : index
    %c0_3 = arith.constant 0 : index
    %4 = vector.load %arg3[%c0_2, %c0_3] : memref<16x128xf32, #tpu.memory_space<vmem>>, vector<16x128xf32>
    %cst = arith.constant 1.000000e+00 : f32
    %5 = vector.broadcast %cst : f32 to vector<16x128xf32>
    %6 = arith.cmpf oeq, %4, %5 : vector<16x128xf32>
    %7 = arith.extui %6 : vector<16x128xi1> to vector<16x128xi32>
    %8 = arith.sitofp %7 : vector<16x128xi32> to vector<16x128xf32>
    %cst_4 = arith.constant 1.000000e+00 : f32
    %9 = vector.broadcast %cst_4 : f32 to vector<16x128xf32>
    %10 = arith.cmpf olt, %4, %9 : vector<16x128xf32>
    %11 = arith.extui %10 : vector<16x128xi1> to vector<16x128xi32>
    %12 = arith.sitofp %11 : vector<16x128xi32> to vector<16x128xf32>
    %cst_5 = arith.constant 1.000000e+00 : f32
    %13 = vector.broadcast %cst_5 : f32 to vector<16x128xf32>
    %14 = arith.subf %13, %3 : vector<16x128xf32>
    %cst_6 = arith.constant 1.000000e+00 : f32
    %15 = vector.broadcast %cst_6 : f32 to vector<16x128xf32>
    %16 = arith.subf %15, %4 : vector<16x128xf32>
    %17 = arith.mulf %16, %16 : vector<16x128xf32>
    %18 = arith.mulf %17, %17 : vector<16x128xf32>
    %19 = arith.mulf %14, %14 : vector<16x128xf32>
    %20 = arith.mulf %3, %3 : vector<16x128xf32>
    %21 = math.log %3 : vector<16x128xf32>
    %22 = arith.mulf %21, %19 : vector<16x128xf32>
    %23 = arith.mulf %22, %8 : vector<16x128xf32>
    %24 = math.log %14 : vector<16x128xf32>
    %25 = arith.mulf %24, %20 : vector<16x128xf32>
    %26 = arith.mulf %25, %18 : vector<16x128xf32>
    %27 = arith.mulf %26, %12 : vector<16x128xf32>
    %c0_7 = arith.constant 0 : index
    %c0_8 = arith.constant 0 : index
    %28 = vector.load %arg6[%c0_7, %c0_8] : memref<16x128xf32, #tpu.memory_space<vmem>>, vector<16x128xf32>
    %29 = arith.addf %28, %8 : vector<16x128xf32>
    %c0_9 = arith.constant 0 : index
    %c0_10 = arith.constant 0 : index
    %30 = vector.load %arg6[%c0_9, %c0_10] : memref<16x128xf32, #tpu.memory_space<vmem>>, vector<16x128xf32>
    tpu.vector_store %arg6[%c0_9, %c0_10], %29 {strides = array<i32>} : memref<16x128xf32, #tpu.memory_space<vmem>>, vector<16x128xf32>,
    %c0_11 = arith.constant 0 : index
    %c0_12 = arith.constant 0 : index
    %31 = vector.load %arg7[%c0_11, %c0_12] : memref<16x128xf32, #tpu.memory_space<vmem>>, vector<16x128xf32>
    %32 = arith.addf %23, %27 : vector<16x128xf32>
    %33 = arith.addf %31, %32 : vector<16x128xf32>
    %c0_13 = arith.constant 0 : index
    %c0_14 = arith.constant 0 : index
    %34 = vector.load %arg7[%c0_13, %c0_14] : memref<16x128xf32, #tpu.memory_space<vmem>>, vector<16x128xf32>
    tpu.vector_store %arg7[%c0_13, %c0_14], %33 {strides = array<i32>} : memref<16x128xf32, #tpu.memory_space<vmem>>, vector<16x128xf32>,
    %c0_i32_15 = arith.constant 0 : i32
    %35 = arith.cmpi eq, %arg1, %c0_i32_15 : i32
    %36 = arith.extui %35 : i1 to i32
    %c0_i32_16 = arith.constant 0 : i32
    %37 = arith.cmpi ne, %36, %c0_i32_16 : i32
    scf.if %37 {
      %c0_17 = arith.constant 0 : index
      %c0_18 = arith.constant 0 : index
      %38 = vector.load %arg6[%c0_17, %c0_18] : memref<16x128xf32, #tpu.memory_space<vmem>>, vector<16x128xf32>
      %39 = vector.shape_cast %38 : vector<16x128xf32> to vector<1x16x128xf32>
      %cst_19 = arith.constant dense<0.000000e+00> : vector<1xf32>
      %40 = vector.multi_reduction <add>, %39, %cst_19 [1, 2] : vector<1x16x128xf32> to vector<1xf32>
      %41 = vector.shape_cast %40 : vector<1xf32> to vector<1x1x1xf32>
      %42 = vector.extract %41[0, 0, 0] : f32 from vector<1x1x1xf32>
      %43 = vector.broadcast %42 : f32 to vector<1x1xf32>
      %44 = vector.shape_cast %43 : vector<1x1xf32> to vector<1x1x1xf32>
      %c0_20 = arith.constant 0 : index
      %c0_21 = arith.constant 0 : index
      %c0_22 = arith.constant 0 : index
      %45 = vector.load %arg4[%c0_20, %c0_21, %c0_22] : memref<1x1x1xf32, #tpu.memory_space<vmem>>, vector<1x1x1xf32>
      tpu.vector_store %arg4[%c0_20, %c0_21, %c0_22], %44 {strides = array<i32>} : memref<1x1x1xf32, #tpu.memory_space<vmem>>, vector<1x1x1xf32>,
      %c0_23 = arith.constant 0 : index
      %c0_24 = arith.constant 0 : index
      %46 = vector.load %arg7[%c0_23, %c0_24] : memref<16x128xf32, #tpu.memory_space<vmem>>, vector<16x128xf32>
      %47 = vector.shape_cast %46 : vector<16x128xf32> to vector<1x16x128xf32>
      %cst_25 = arith.constant dense<0.000000e+00> : vector<1xf32>
      %48 = vector.multi_reduction <add>, %47, %cst_25 [1, 2] : vector<1x16x128xf32> to vector<1xf32>
      %49 = vector.shape_cast %48 : vector<1xf32> to vector<1x1x1xf32>
      %50 = vector.extract %49[0, 0, 0] : f32 from vector<1x1x1xf32>
      %51 = vector.broadcast %50 : f32 to vector<1x1xf32>
      %52 = vector.shape_cast %51 : vector<1x1xf32> to vector<1x1x1xf32>
      %c0_26 = arith.constant 0 : index
      %c0_27 = arith.constant 0 : index
      %c0_28 = arith.constant 0 : index
      %53 = vector.load %arg5[%c0_26, %c0_27, %c0_28] : memref<1x1x1xf32, #tpu.memory_space<vmem>>, vector<1x1x1xf32>
      tpu.vector_store %arg5[%c0_26, %c0_27, %c0_28], %52 {strides = array<i32>} : memref<1x1x1xf32, #tpu.memory_space<vmem>>, vector<1x1x1xf32>,
    } else {
    }
    return
  }
  func.func @transform_0(%arg0: i32, %arg1: i32) -> (i32, i32) {
    %c1_i32 = arith.constant 1 : i32
    %0 = arith.muli %arg0, %c1_i32 : i32
    %1 = arith.addi %0, %arg1 : i32
    %c0_i32 = arith.constant 0 : i32
    %c0_i32_0 = arith.constant 0 : i32
    return %1, %c0_i32 : i32, i32
  }
  func.func @transform_1(%arg0: i32, %arg1: i32) -> (i32, i32) {
    %c1_i32 = arith.constant 1 : i32
    %0 = arith.muli %arg0, %c1_i32 : i32
    %1 = arith.addi %0, %arg1 : i32
    %c0_i32 = arith.constant 0 : i32
    %c0_i32_0 = arith.constant 0 : i32
    return %1, %c0_i32 : i32, i32
  }
  func.func @transform_2(%arg0: i32, %arg1: i32) -> (i32, i32, i32) {
    %c0_i32 = arith.constant 0 : i32
    %c0_i32_0 = arith.constant 0 : i32
    %c0_i32_1 = arith.constant 0 : i32
    return %arg0, %c0_i32, %c0_i32_0 : i32, i32, i32
  }
  func.func @transform_3(%arg0: i32, %arg1: i32) -> (i32, i32, i32) {
    %c0_i32 = arith.constant 0 : i32
    %c0_i32_0 = arith.constant 0 : i32
    %c0_i32_1 = arith.constant 0 : i32
    return %arg0, %c0_i32, %c0_i32_0 : i32, i32, i32
  }
}

</mosaic_0001>

<bundles_post_ra>
// kernel: tpu_custom_call.1
= control target key start
LH: loop header
LB: loop body
LE: loop exit
PB: predicated region body
PF: predicated region fallthrough
CT: control target
= control target key end

     0   :  { %9 = vsyncpa [#allocation5], 0  ;;  %s337_s0 = inlined_call_operand.hbm [shape: f32[16,128], index: 0, kind: input, shape index: {}]   ;;  %s338_s1 = inlined_call_operand.hbm [shape: f32[16,128], index: 1, kind: input, shape index: {}]   ;;  %s339_s2 = inlined_call_operand.hbm [shape: f32[1,1,1], index: 2, kind: output, shape index: {0}]   ;;  %s340_s3 = inlined_call_operand.hbm [shape: f32[1,1,1], index: 3, kind: output, shape index: {1}]  }
   0x1   :  { %10 = vsyncpa [#allocation8], 0 }
   0x2   :  { %11 = vsyncpa [#allocation6], 0 }
   0x3   :  { %12 = vsyncpa [#allocation11], 0  ;;  %s296_s12 = smov [#allocation4]  }
   0x4   :  { %s22_s13 = sshll.u32 %s296_s12, 4  ;;  %s23_s13 = int_to_ptr.vmem [resolvable:$true] %s22_s13 }
   0x5   :  { %s216_s14 = scalar_lea.vmem %s23_s13, 256  ;;  %p221_p1 = scmp.lt.s32.totalorder %s23_s13, %s23_s13 }
   0x6   :  { %p217_p0 = scmp.ne.s32.totalorder %s23_s13, %s216_s14  ;;  %p222_p2 = scmp.lt.s32.totalorder %s216_s14, %s216_s14 }
   0x8   :  { %p223_p3 = por %p222_p2, %p221_p1 }
   0xa   :  { %p224_p4 = pnand %p223_p3, %p217_p0 }
   0xc   :  { %227 = shalt.err (!%p224_p4)
}
   0xd   :  { %s297_s15 = smov 128   ;;  %s298_s16 = smov 8  }
   0xe   :  { %28 = dma.hbm_to_vmem [thread:$0]  %s337_s0, 256, %s23_s13, [#allocation5], %s297_s15, %s297_s15, %s298_s16  }
   0xf   :  { %s299_s19 = smov [#allocation7]  }
  0x10   :  { %s38_s20 = sshll.u32 %s299_s19, 4  ;;  %s39_s20 = int_to_ptr.vmem [resolvable:$true] %s38_s20 }
  0x11   :  { %s236_s21 = scalar_lea.vmem %s39_s20, 256  ;;  %p241_p6 = scmp.lt.s32.totalorder %s39_s20, %s39_s20 }
  0x12   :  { %p237_p5 = scmp.ne.s32.totalorder %s39_s20, %s236_s21  ;;  %p242_p7 = scmp.lt.s32.totalorder %s236_s21, %s236_s21 }
  0x14   :  { %p243_p8 = por %p242_p7, %p241_p6 }
  0x16   :  { %p244_p9 = pnand %p243_p8, %p237_p5 }
  0x18   :  { %247 = shalt.err (!%p244_p9)
}
  0x19   :  { %44 = dma.hbm_to_vmem [thread:$0]  %s338_s1, 256, %s39_s20, [#allocation8], %s297_s15, %s297_s15, %s298_s16  }
  0x1a   :  { %288 = dma.done.wait [#allocation5], 256  }
  0x1b   :  { %289 = vsyncadd [#allocation5], 4294967040 }
  0x1c   :  { %290 = dma.done.wait [#allocation8], 256  }
  0x1d   :  { %291 = vsyncadd [#allocation8], 4294967040  ;;  %v65_v0 = vld [vmem:[#allocation7] sm:$0xff]  ;;  %v66_v1 = vld [vmem:[#allocation7 + $0x8] sm:$0xff]  ;;  %v300_v4 = vmov 0.0   ;;  %s301_s0 = smov [#allocation9]  }
  0x1e   :  { %v63_v2 = vld [vmem:[#allocation4] sm:$0xff]  ;;  %vm67_vm0 = vcmp.eq.f32.partialorder %v65_v0, 1.0  ;;  %vm68_vm1 = vcmp.eq.f32.partialorder %v66_v1, 1.0  ;;  %v64_v3 = vld [vmem:[#allocation4 + $0x8] sm:$0xff]  ;;  %v81_v10 = vsub.f32 1.0, %v65_v0  ;;  %v82_v11 = vsub.f32 1.0, %v66_v1 }
  0x1f   :  { %v185_v5 = vsel %vm67_vm0, 1.0, %v300_v4  ;;  %v186_v6 = vsel %vm68_vm1, 1.0, %v300_v4  ;;  %v79_v8 = vsub.f32 1.0, %v63_v2  ;;  %v80_v9 = vsub.f32 1.0, %v64_v3  ;;  %s161_s1 = sshll.u32 %s301_s0, 4  ;;  %s162_s1 = int_to_ptr.vmem [resolvable:$true] %s161_s1 }
  0x20   :  { %v128_v7 = vadd.f32 %v186_v6, %v185_v5  ;;  %200 = vlog2.f32 %v63_v2  ;;  %v83_v12 = vmul.f32 %v81_v10, %v81_v10  ;;  %v84_v15 = vmul.f32 %v82_v11, %v82_v11  ;;  %s248_s25 = scalar_lea.vmem %s162_s1, 16  ;;  %s252_s26 = scalar_lea.vmem %s162_s1, 32 }
  0x21   :  { %202 = vlog2.f32 %v64_v3  ;;  %v87_v13 = vmul.f32 %v79_v8, %v79_v8  ;;  %v88_v16 = vmul.f32 %v80_v9, %v80_v9  ;;  %v89_v19 = vmul.f32 %v63_v2, %v63_v2  ;;  %p249_p10 = scmp.ne.s32.totalorder %s162_s1, %s248_s25  ;;  %p253_p11 = scmp.lt.s32.totalorder %s162_s1, %s162_s1 }
  0x22   :  { %129 = vadd.xlane.f32.xlu0 %v128_v7  ;;  %204 = vlog2.f32 %v79_v8  ;;  %v90_v22 = vmul.f32 %v64_v3, %v64_v3  ;;  %vm73_vm2 = vcmp.lt.f32.partialorder %v65_v0, 1.0  ;;  %v85_v24 = vmul.f32 %v83_v12, %v83_v12  ;;  %p254_p12 = scmp.lt.s32.totalorder %s252_s26, %s248_s25 }
  0x23   :  { %206 = vlog2.f32 %v80_v9  ;;  %vm74_vm3 = vcmp.lt.f32.partialorder %v66_v1, 1.0  ;;  %v86_v27 = vmul.f32 %v84_v15, %v84_v15  ;;  %v187_v31 = vsel %vm73_vm2, 1.0, %v300_v4 }
  0x24   :  { %v188_v34 = vsel %vm74_vm3, 1.0, %v300_v4  ;;  %vm139_vm4 = vcmask 0   ;;  %p255_p13 = por %p254_p12, %p253_p11 }
  0x26   :  { %p256_p0 = pnand %p255_p13, %p249_p10 }
  0x2d   :  { %v201_v14 = vpop.eup %200 }
  0x2e   :  { %v203_v17 = vpop.eup %202  ;;  %v92_v18 = vmul.f32 0.6931472, %v201_v14 }
  0x2f   :  { %v205_v20 = vpop.eup %204  ;;  %v94_v21 = vmul.f32 0.6931472, %v203_v17 }
  0x30   :  { %v207_v23 = vpop.eup %206  ;;  %v95_v25 = vmul.f32 %v92_v18, %v87_v13  ;;  %v100_v26 = vmul.f32 0.6931472, %v205_v20 }
  0x31   :  { %v96_v28 = vmul.f32 %v94_v21, %v88_v16  ;;  %v102_v29 = vmul.f32 0.6931472, %v207_v23 }
  0x32   :  { %v103_v30 = vmul.f32 %v100_v26, %v89_v19  ;;  %v97_v33 = vmul.f32 %v185_v5, %v95_v25 }
  0x33   :  { %v104_v32 = vmul.f32 %v102_v29, %v90_v22  ;;  %v98_v36 = vmul.f32 %v186_v6, %v96_v28 }
  0x34   :  { %v105_v35 = vmul.f32 %v103_v30, %v85_v24 }
  0x35   :  { %v106_v37 = vmul.f32 %v104_v32, %v86_v27 }
  0x36   :  { %v107_v38 = vmul.f32 %v187_v31, %v105_v35 }
  0x37   :  { %v108_v39 = vmul.f32 %v188_v34, %v106_v37 }
  0x38   :  { %v117_v40 = vadd.f32 %v107_v38, %v97_v33 }
  0x39   :  { %v118_v41 = vadd.f32 %v108_v39, %v98_v36 }
  0x3b   :  { %v143_v42 = vadd.f32 %v118_v41, %v117_v40 }
  0x3d   :  { %144 = vadd.xlane.f32.xlu0 %v143_v42 }
  0xab   :  { %v130_v43 = vpop.xlane.xlu0 %129 }
  0xac   :  { %v131_v44 = vrot.slane %v130_v43, 4 }
  0xae   :  { %v132_v45 = vadd.f32 %v131_v44, %v130_v43 }
  0xb0   :  { %v133_v46 = vrot.slane %v132_v45, 2 }
  0xb2   :  { %v134_v47 = vadd.f32 %v133_v46, %v132_v45 }
  0xb4   :  { %v135_v48 = vrot.slane %v134_v47, 1 }
  0xb6   :  { %v136_v49 = vadd.f32 %v135_v48, %v134_v47 }
  0xb8   :  { %189 = vpush %v136_v49 }
  0xc6   :  { %v145_v50 = vpop.xlane.xlu0 %144 }
  0xc7   :  { %v146_v51 = vrot.slane %v145_v50, 4 }
  0xc9   :  { %v147_v52 = vadd.f32 %v146_v51, %v145_v50 }
  0xcb   :  { %v148_v53 = vrot.slane %v147_v52, 2 }
  0xcd   :  { %v149_v54 = vadd.f32 %v148_v53, %v147_v52 }
  0xcf   :  { %v150_v55 = vrot.slane %v149_v54, 1 }
  0xd1   :  { %v151_v56 = vadd.f32 %v150_v55, %v149_v54 }
  0xd3   :  { %191 = vpush %v151_v56 }
  0xe9   :  { %s190_s24 = spop %189 }
  0xea   :  { %v138_v57 = vstv %s190_s24 }
  0xeb   :  { %140 = vst.msk [vmem:[#allocation9] sm:$0x1] %vm139_vm4, %v138_v57 }
  0xec   :  { %259 = shalt.err (!%p256_p0)
}
  0xed   :  { %164 = dma.vmem_to_hbm [thread:$0]  %s162_s1, 16, %s339_s2, [#allocation6]  }
  0xee   :  { %s302_s29 = smov [#allocation10]  }
  0xef   :  { %s171_s30 = sshll.u32 %s302_s29, 4  ;;  %s172_s30 = int_to_ptr.vmem [resolvable:$true] %s171_s30 }
  0xf0   :  { %s268_s5 = scalar_lea.vmem %s172_s30, 16  ;;  %s272_s6 = scalar_lea.vmem %s172_s30, 32 }
  0xf1   :  { %p269_p1 = scmp.ne.s32.totalorder %s172_s30, %s268_s5  ;;  %p273_p2 = scmp.lt.s32.totalorder %s172_s30, %s172_s30 }
  0xf2   :  { %p274_p3 = scmp.lt.s32.totalorder %s272_s6, %s268_s5 }
  0xf4   :  { %p275_p4 = por %p274_p3, %p273_p2 }
  0xf6   :  { %p276_p5 = pnand %p275_p4, %p269_p1 }
 0x104   :  { %s192_s4 = spop %191 }
 0x105   :  { %v153_v58 = vstv %s192_s4 }
 0x106   :  { %154 = vst.msk [vmem:[#allocation10] sm:$0x1] %vm139_vm4, %v153_v58 }
 0x107   :  { %279 = shalt.err (!%p276_p5)
}
 0x108   :  { %174 = dma.vmem_to_hbm [thread:$0]  %s172_s30, 16, %s340_s3, [#allocation11]  }
 0x109   :  { %292 = dma.done.wait [#allocation6], 16  }
 0x10a   :  { %293 = vsyncadd [#allocation6], 4294967280 }
 0x10b   :  { %294 = dma.done.wait [#allocation11], 16  }
 0x10c   :  { %295 = vsyncadd [#allocation11], 4294967280 }
 0x10d   :  { %181 = vsyncpa [#allocation5], 1 }
 0x10e   :  { %182 = vsyncpa [#allocation8], 1 }
 0x10f   :  { %183 = vsyncpa [#allocation6], 1 }
 0x110   :  { %184 = vsyncpa [#allocation11], 1 }

</bundles_post_ra>
